<compile_context>
chip_gen: v6e
topology: v6e:2x2x1
jax: 0.10.0
libtpu: 0.0.40
codegen_flags: <defaults>
</compile_context>

<pallas_src>
import numpy as np
import jax
import jax.numpy as jnp
from jax.experimental import pallas as pl
from jax.experimental.pallas import tpu as pltpu


def _cdiv(a, b):
    return -(-a // b)


# --------------------------------------------------------------------------- #
# Folded operator construction (tiny; precompute once per weight and reuse).  #
# --------------------------------------------------------------------------- #
def fold_time_conv_weight(weight, t, dtype=jnp.float32):
    """Fold left-pad + Conv1d(k=2, no bias) + both torch .view quirks into one
    (t*c, t*c) matrix Mt with
        y[b, g, p] = sum_f Mt[g, f] * x[b, f, p]
    where f = t_i*c + c_i is the flat (t, c) slab of the ORIGINAL layout and
    g = t_o*c + c_o is the flat (t, c) slab of the FINAL layout."""
    c = weight.shape[0]
    assert weight.shape == (c, c, 2)
    w0 = weight[:, :, 0].astype(jnp.float32)       # tap applied to x[l-1] (padded tap)
    w1 = weight[:, :, 1].astype(jnp.float32)       # tap applied to x[l]
    eye_t = jnp.eye(t, dtype=jnp.float32)          # delta(l' == l)
    sub_t = jnp.eye(t, k=-1, dtype=jnp.float32)    # delta(l' == l - 1)
    # Mt[l*c + o, i*t + l'] = W1[o,i]*d(l'==l) + W0[o,i]*d(l'==l-1)
    mt = (jnp.einsum('oi,lm->loim', w1, eye_t) +
          jnp.einsum('oi,lm->loim', w0, sub_t))
    return mt.reshape(t * c, t * c).astype(dtype)


def spatial_view_permutation(h, w, dtype=jnp.float32):
    """(h*w, h*w) 0/1 matrix P with (y @ P)[:, q] = y[:, (q % h)*w + (q // h)].

    This is exactly the pixel shuffle induced by torch's (b,w,h) -> (b,h,w)
    .view reinterpretation; applied as a matmul it is exact (one 1 per column)."""
    s = h * w
    q = jnp.arange(s)
    src = (q % h) * w + (q // h)
    return (jnp.arange(s)[:, None] == src[None, :]).astype(dtype)


# --------------------------------------------------------------------------- #
# Kernels.                                                                    #
# --------------------------------------------------------------------------- #
def _timeconv_fused_kernel(x_ref, w_ref, p_ref, o_ref):
    # x_ref: (1, F, S)  w_ref: (F, F)  p_ref: (S, S)  o_ref: (1, F, S)
    y = jnp.dot(w_ref[...], x_ref[0], preferred_element_type=jnp.float32)
    y = jnp.dot(y.astype(p_ref.dtype), p_ref[...],
                preferred_element_type=jnp.float32)
    o_ref[0] = y.astype(o_ref.dtype)


def _timeconv_matmul_kernel(x_ref, w_ref, o_ref):
    # x_ref: (1, F, TS)  w_ref: (F, F)  o_ref: (1, F, TS)
    o_ref[0] = jnp.dot(w_ref[...], x_ref[0],
                       preferred_element_type=jnp.float32).astype(o_ref.dtype)


# --------------------------------------------------------------------------- #
# Hardware-aware sizing helpers.                                              #
# --------------------------------------------------------------------------- #
def _vmem_plan_bytes():
    """Planning budget for VMEM (also passed as vmem_limit_bytes)."""
    budget = 48 * 1024 * 1024                       # safe on v7x (64 MiB physical)
    try:
        cap = int(getattr(pltpu.get_tpu_info(), "vmem_capacity_bytes"))
        if cap >= 100 * 1024 * 1024:                # v5e / v6e: 128 MiB physical
            budget = 96 * 1024 * 1024
        else:
            budget = min(budget, int(cap * 0.75))
    except Exception:
        pass                                        # keep the conservative default
    return budget


def _maybe_single_buffered(nbytes):
    """Large constant-index operands don't need double buffering (v7x VMEM)."""
    return {"pipeline_mode": pl.Buffered(1)} if nbytes > (2 << 20) else {}


def _pick_pixel_tile(s, f, in_item, out_item, budget):
    """Pixels per block for the non-fused path (lane dim of every block)."""
    if s <= 512:
        return s
    weight_bytes = f * f * in_item
    per_pixel = 2 * f * (in_item + out_item)        # double-buffered in + out
    by_target = (8 << 20) // max(f * in_item, 1)    # ~8 MiB input blocks
    by_budget = max(128, (budget - weight_bytes - (8 << 20)) // max(per_pixel, 1))
    ts = int(min(by_target, by_budget, s))
    ts = max(128, ts // 128 * 128)
    if ts < s:
        # Near-equal blocks with an even count (keeps both v7x TCs busy).
        nblk = _cdiv(s, ts)
        nblk += nblk % 2
        ts = min(s, max(128, _cdiv(_cdiv(s, nblk), 128) * 128))
    return ts


# --------------------------------------------------------------------------- #
# Public wrapper.                                                             #
# --------------------------------------------------------------------------- #
def time_conv_pallas(video, weight, *, compute_dtype=None, folded_weight=None,
                     fuse_spatial=None):
    """video: (b, t, c, h, w); weight: Conv1d weight (dim, dim, 2), dim == c.

    compute_dtype=jnp.bfloat16 enables bf16 MXU inputs with f32 accumulation
    (faster, relaxes the exact-f32 match).  folded_weight can be precomputed
    with fold_time_conv_weight() and cached across calls."""
    b, t, c, h, w = video.shape
    assert weight.shape == (c, c, 2)
    f = t * c
    s = h * w
    out_dtype = video.dtype
    cdt = jnp.dtype(compute_dtype) if compute_dtype is not None else jnp.dtype(out_dtype)

    if folded_weight is None:
        folded_weight = fold_time_conv_weight(weight, t, dtype=cdt)
    mt = folded_weight.astype(cdt)

    # Free reshape (contiguous trailing-dim merge): no HBM transpose pass.
    x = video.reshape(b, f, s).astype(cdt)

    budget = _vmem_plan_bytes()
    in_item = jnp.dtype(cdt).itemsize
    out_item = jnp.dtype(out_dtype).itemsize

    # Fuse the output-side pixel shuffle into the kernel when the S x S
    # permutation matmul is cheap and everything fits comfortably in VMEM.
    fused_bytes = (2 * f * s * in_item + 2 * f * s * out_item
                   + f * f * in_item + s * s * in_item)
    if fuse_spatial is None:
        fuse_spatial = (s <= 2048) and (s <= max(512, 4 * f)) \
            and (fused_bytes <= int(budget * 0.7))

    if fuse_spatial:
        p_mat = spatial_view_permutation(h, w, dtype=cdt)
        y = pl.pallas_call(
            _timeconv_fused_kernel,
            out_shape=jax.ShapeDtypeStruct((b, f, s), out_dtype),
            grid=(b,),
            in_specs=[
                pl.BlockSpec((1, f, s), lambda i: (i, 0, 0)),
                pl.BlockSpec((f, f), lambda i: (0, 0),
                             **_maybe_single_buffered(f * f * in_item)),
                pl.BlockSpec((s, s), lambda i: (0, 0),
                             **_maybe_single_buffered(s * s * in_item)),
            ],
            out_specs=pl.BlockSpec((1, f, s), lambda i: (i, 0, 0)),
            compiler_params=pltpu.CompilerParams(
                dimension_semantics=("parallel",),
                vmem_limit_bytes=budget),
        )(x, mt, p_mat)
        # Rows are already (t, c)-major and pixels already in final order:
        # this reshape is free.
        return y.reshape(b, t, c, h, w)

    # ----- fallback for large spatial planes: tile the pixel (lane) axis ----
    ts = _pick_pixel_tile(s, f, in_item, out_item, budget)
    y = pl.pallas_call(
        _timeconv_matmul_kernel,
        out_shape=jax.ShapeDtypeStruct((b, f, s), out_dtype),
        grid=(b, _cdiv(s, ts)),
        in_specs=[
            pl.BlockSpec((1, f, ts), lambda i, j: (i, 0, j)),
            pl.BlockSpec((f, f), lambda i, j: (0, 0),
                         **_maybe_single_buffered(f * f * in_item)),
        ],
        out_specs=pl.BlockSpec((1, f, ts), lambda i, j: (i, 0, j)),
        compiler_params=pltpu.CompilerParams(
            dimension_semantics=("parallel", "parallel"),
            vmem_limit_bytes=budget),
    )(x, mt)
    # TODO(synk): fold this remaining spatial shuffle into the kernel too
    # (per-(t,c) (h,w)->(w,h) VMEM transpose) once lane-dim reshapes are safe.
    y = y.reshape(b, t, c, h, w)
    y = jnp.swapaxes(y, -1, -2)           # the single remaining HBM transpose
    return y.reshape(b, t, c, h, w)


# --------------------------------------------------------------------------- #
# Exact reference (NumPy float64) mirroring the PyTorch forward.              #
# --------------------------------------------------------------------------- #
def time_conv_reference(video, weight):
    video = np.asarray(video, dtype=np.float64)
    weight = np.asarray(weight, dtype=np.float64)
    b, t, c, h, w = video.shape
    v = np.transpose(video, (0, 4, 3, 1, 2)).reshape(b * w * h, c, t)
    vp = np.pad(v, ((0, 0), (0, 0), (1, 0)))               # F.pad(video, (1, 0))
    y = (np.einsum('oi,nil->nol', weight[:, :, 0], vp[:, :, :t]) +
         np.einsum('oi,nil->nol', weight[:, :, 1], vp[:, :, 1:]))
    y = y.reshape(b, h, w, c, t)
    return np.transpose(y, (0, 4, 3, 1, 2))


if __name__ == "__main__":
    key = jax.random.PRNGKey(0)
    k_vid, k_w = jax.random.split(key)

    # h != w on purpose so the (b,w,h)->(b,h,w) .view quirk is exercised.
    b, t, c, h, w = 2, 8, 4, 16, 8
    dim = c

    video = jax.random.normal(k_vid, (b, t, c, h, w), dtype=jnp.float32)
    # Conv1d(dim, dim, 2, bias=False) weight shape: (out=dim, in=dim, kernel=2)
    weight = 0.5 * jax.random.normal(k_w, (dim, dim, 2), dtype=jnp.float32)

    out_fused = jax.block_until_ready(time_conv_pallas(video, weight))
    out_tiled = jax.block_until_ready(
        time_conv_pallas(video, weight, fuse_spatial=False))
    ref = time_conv_reference(video, weight)

    assert out_fused.shape == (b, t, c, h, w)
    assert out_tiled.shape == (b, t, c, h, w)
    # Tolerance covers MXU f32-emulation rounding vs the exact float64 NumPy
    # reference; any layout / permutation bug would be O(1) off and fail.
    assert np.allclose(np.asarray(out_fused), ref, rtol=2e-2, atol=2e-2), \
        "fused path mismatch vs reference"
    assert np.allclose(np.asarray(out_tiled), ref, rtol=2e-2, atol=2e-2), \
        "tiled path mismatch vs reference"

    print("KERNEL_OK")
</pallas_src>

<mosaic_0001>
module attributes {stable_mosaic.version = 11 : i64} {
  func.func @_timeconv_fused_kernel(%arg0: i32, %arg1: memref<1x32x128xf32, #tpu.memory_space<vmem>>, %arg2: memref<32x32xf32, #tpu.memory_space<vmem>>, %arg3: memref<128x128xf32, #tpu.memory_space<vmem>>, %arg4: memref<1x32x128xf32, #tpu.memory_space<vmem>>) attributes {dimension_semantics = [#tpu.dimension_semantics<parallel>], iteration_bounds = array<i64: 2>, scalar_prefetch = 0 : i64, scratch_operands = 0 : i64, tpu.core_type = #tpu.core_type<tc>, window_params = [{transform_indices = @transform_0, window_bounds = array<i64: 1, 32, 128>}, {pipeline_mode = #tpu.pipeline_mode<synchronous>, transform_indices = @transform_1, window_bounds = array<i64: 32, 32>}, {pipeline_mode = #tpu.pipeline_mode<synchronous>, transform_indices = @transform_2, window_bounds = array<i64: 128, 128>}, {transform_indices = @transform_3, window_bounds = array<i64: 1, 32, 128>}]} {
    %c0 = arith.constant 0 : index
    %c0_0 = arith.constant 0 : index
    %0 = vector.load %arg2[%c0, %c0_0] : memref<32x32xf32, #tpu.memory_space<vmem>>, vector<32x32xf32>
    %c0_1 = arith.constant 0 : index
    %c0_2 = arith.constant 0 : index
    %c0_3 = arith.constant 0 : index
    %1 = vector.load %arg1[%c0_1, %c0_2, %c0_3] : memref<1x32x128xf32, #tpu.memory_space<vmem>>, vector<1x32x128xf32>
    %2 = vector.shape_cast %1 : vector<1x32x128xf32> to vector<32x128xf32>
    %cst = arith.constant dense<0.000000e+00> : vector<32x128xf32>
    %3 = tpu.matmul %0, %2, %cst {dimension_numbers = #tpu.dot_dimension_numbers<[1], [0], [0], [1], [0, 0, 1, 1], [], []>} : vector<32x32xf32>, vector<32x128xf32>, vector<32x128xf32> -> vector<32x128xf32>
    %c0_4 = arith.constant 0 : index
    %c0_5 = arith.constant 0 : index
    %4 = vector.load %arg3[%c0_4, %c0_5] : memref<128x128xf32, #tpu.memory_space<vmem>>, vector<128x128xf32>
    %cst_6 = arith.constant dense<0.000000e+00> : vector<32x128xf32>
    %5 = tpu.matmul %3, %4, %cst_6 {dimension_numbers = #tpu.dot_dimension_numbers<[1], [0], [0], [1], [0, 0, 1, 1], [], []>} : vector<32x128xf32>, vector<128x128xf32>, vector<32x128xf32> -> vector<32x128xf32>
    %c0_7 = arith.constant 0 : index
    %c0_8 = arith.constant 0 : index
    %c0_9 = arith.constant 0 : index
    %6 = vector.load %arg4[%c0_7, %c0_8, %c0_9] : memref<1x32x128xf32, #tpu.memory_space<vmem>>, vector<1x32x128xf32>
    %7 = vector.shape_cast %6 : vector<1x32x128xf32> to vector<32x128xf32>
    %8 = vector.shape_cast %5 : vector<32x128xf32> to vector<1x32x128xf32>
    tpu.vector_store %arg4[%c0_7, %c0_8, %c0_9], %8 {strides = array<i32>} : memref<1x32x128xf32, #tpu.memory_space<vmem>>, vector<1x32x128xf32>,
    return
  }
  func.func @transform_0(%arg0: i32) -> (i32, i32, i32) {
    %c0_i32 = arith.constant 0 : i32
    %c0_i32_0 = arith.constant 0 : i32
    %c0_i32_1 = arith.constant 0 : i32
    return %arg0, %c0_i32, %c0_i32_0 : i32, i32, i32
  }
  func.func @transform_1(%arg0: i32) -> (i32, i32) {
    %c0_i32 = arith.constant 0 : i32
    %c0_i32_0 = arith.constant 0 : i32
    %c0_i32_1 = arith.constant 0 : i32
    return %c0_i32, %c0_i32_0 : i32, i32
  }
  func.func @transform_2(%arg0: i32) -> (i32, i32) {
    %c0_i32 = arith.constant 0 : i32
    %c0_i32_0 = arith.constant 0 : i32
    %c0_i32_1 = arith.constant 0 : i32
    return %c0_i32, %c0_i32_0 : i32, i32
  }
  func.func @transform_3(%arg0: i32) -> (i32, i32, i32) {
    %c0_i32 = arith.constant 0 : i32
    %c0_i32_0 = arith.constant 0 : i32
    %c0_i32_1 = arith.constant 0 : i32
    return %arg0, %c0_i32, %c0_i32_0 : i32, i32, i32
  }
}

</mosaic_0001>

<bundles_post_ra>
// kernel: tpu_custom_call.1
= control target key start
LH: loop header
LB: loop body
LE: loop exit
PB: predicated region body
PF: predicated region fallthrough
CT: control target
= control target key end

     0   :  { %8 = vsyncpa [#allocation3], 0  ;;  %s1093_s0 = inlined_call_operand.hbm [shape: f32[2,32,128], index: 0, kind: input, shape index: {}]   ;;  %s1094_s1 = inlined_call_operand.hbm [shape: f32[32,32], index: 1, kind: input, shape index: {}]   ;;  %s1095_s2 = inlined_call_operand.hbm [shape: f32[128,128], index: 2, kind: input, shape index: {}]   ;;  %s1096_s3 = inlined_call_operand.hbm [shape: f32[2,32,128], index: 3, kind: output, shape index: {}]  }
   0x1   :  { %10 = vsyncpa [#allocation3 + $0x1], 0 }
   0x2   :  { %11 = vsyncpa [#allocation6], 0 }
   0x3   :  { %12 = vsyncpa [#allocation4], 0 }
   0x4   :  { %14 = vsyncpa [#allocation4 + $0x1], 0  ;;  %s888_s12 = smov 0   ;;  %s890_s13 = smov 0  }
   0x5   :  { %s892_s14 = smov 0   ;;  %s894_s15 = smov 0  }
   0x6 LB: > { %s909_s16 = sadd.s32 4294967295, %s858_s15   ;;  %s535_s17 = sadd.s32 4294967294, %s858_s15   ;;  %s858_s15 = sphi %s894_s15, %s1117_s15   ;;  %s854_s14 = sphi %s892_s14, %s1116_s14   ;;  %s850_s13 = sphi %s890_s13, %s1115_s13   ;;  %s846_s12 = sphi %s888_s12, %s1114_s12  }
   0x7   : > { %p40_p0 = scmp.ne.s32.totalorder %s850_s13, %s846_s12  ;;  %p1097_p1 = scmp.eq.s32.totalorder %s909_s16, 0 }
   0x8   : > { %p106_p2 = scmp.eq.s32.totalorder %s909_s16, 1  ;;  %p112_p3 = scmp.eq.s32.totalorder %s535_s17, 1 }
   0x9   : > { %p918_p4 = por %p1097_p1, %p40_p0  ;;  %p536_p5 = scmp.ge.s32.totalorder %s858_s15, 1 }
   0xa   : > { %p923_p6 = por %p112_p3, %p40_p0  ;;  %p119_p7 = scmp.lt.s32.totalorder %s858_s15, 3 }
   0xb   : > { %s1101_s18 = scalar_select %p918_p4, 1, 0 }
   0xc   : > { %s1102_s19 = scalar_select %p923_p6, 1, 0 }
   0xd   : > { %p928_p8 = pnand %p536_p5, %p119_p7  ;;  %s860_s21 = smov [#allocation5]  }
   0xe   : > { %s131_s22 = sshll.u32 %s860_s21, 4  ;;  %s861_s24 = smov [#allocation7]   ;;  %s132_s22 = int_to_ptr.vmem [resolvable:$true] %s131_s22 }
   0xf   : > { %s1103_s20 = scalar_select %p928_p8, 1, 0 }
  0x10   : > { %p651_p9 = pneg %p928_p8  ;;  %s144_s25 = sshll.u32 %s861_s24, 4  ;;  %s145_s25 = int_to_ptr.vmem [resolvable:$true] %s144_s25 }
  0x11   : > { %s721_s26 = scalar_lea.vmem %s132_s22, 512  ;;  %p729_p5 = scmp.lt.s32.totalorder %s132_s22, %s132_s22 }
  0x12   : > { %p937_p11 = pnand %p651_p9, %p1097_p1  ;;  %p722_p13 = scmp.ne.s32.totalorder %s132_s22, %s721_s26 }
  0x13   : > { %p730_p7 = scmp.lt.s32.totalorder %s721_s26, %s721_s26 }
  0x14   : > { %p712_p12 = pneg %p937_p11 }
  0x15   : > { %p731_p10 = por %p730_p7, %p729_p5 }
  0x16   : > { %p724_p0 = pnand %p722_p13, %p712_p12 }
  0x18   : > { %p725_p3 = pneg %p724_p0 }
  0x1a   : > { %p732_p9 = pnand %p731_p10, %p725_p3 }
  0x1c   : > { %735 = shalt.err (!%p732_p9)
}
  0x1d   : > { %s862_s27 = smov 128   ;;  %s863_s28 = smov 8  }
  0x1e   : > { %654 = dma.hbm_to_vmem [thread:$0]  (!%p937_p11), %s1094_s1, 512, %s132_s22, [#allocation6], %s862_s27, %s862_s27, %s863_s28  }
  0x1f   : > { %s747_s4 = scalar_lea.vmem %s145_s25, 2048  ;;  %p755_p10 = scmp.lt.s32.totalorder %s145_s25, %s145_s25 }
  0x20   : > { %p748_p13 = scmp.ne.s32.totalorder %s145_s25, %s747_s4  ;;  %p756_p3 = scmp.lt.s32.totalorder %s747_s4, %s747_s4 }
  0x22   : > { %p750_p0 = pnand %p748_p13, %p712_p12  ;;  %p757_p7 = por %p756_p3, %p755_p10 }
  0x24   : > { %p751_p5 = pneg %p750_p0 }
  0x26   : > { %p758_p9 = pnand %p757_p7, %p751_p5 }
  0x28   : > { %761 = shalt.err (!%p758_p9)
}
  0x29   : > { %657 = dma.hbm_to_vmem [thread:$0]  (!%p937_p11), %s1095_s2, 2048, %s145_s25, [#allocation6], %s862_s27, %s862_s27, %s863_s28  }
  0x2a   : > { %s966_s7 = sadd.s32 1, %s858_s15   ;;  %s27_s8 = sadd.s32 1, %s854_s14 }
  0x2b   : > { %s24_s9 = ssub.s32 %s858_s15, %s966_s7  ;;  %p34_p12 = scmp.ne.s32.totalorder %s854_s14, %s850_s13 }
  0x2c   : > { %p25_p13 = scmp.eq.s32.totalorder %s24_s9, 0  ;;  %p35_p0 = scmp.eq.s32.totalorder %s858_s15, 0 }
  0x2d   : > { %p976_p5 = por %p106_p2, %p34_p12  ;;  %p668_p10 = scmp.lt.s32.totalorder %s858_s15, 2 }
  0x2e   : > { %s982_s11 = scalar_select %p25_p13, %s854_s14, %s27_s8  }
  0x2f   : > { %s1105_s10 = scalar_select %p976_p5, 1, 0 }
  0x30   : > { %p36_p3 = por %p35_p0, %p34_p12  ;;  %s158_s17 = sand.u32 1, %s854_s14  }
  0x31   : > { %s540_s21 = sshll.u32 %s158_s17, 5  ;;  %s557_s22 = sshll.u32 %s858_s15, 9 }
  0x32   : > { %s989_s25 = scalar_lea.hbm %s1093_s0, %s557_s22  ;;  %s162_s26 = scalar_lea.vmem [#allocation2], %s540_s21 }
  0x33   : > { %s169_s29 = sshll.u32 %s162_s26, 4  ;;  %p993_p2 = pnand %p668_p10, %p36_p3  ;;  %s991_s29 = int_to_ptr.vmem [resolvable:$true] %s169_s29 }
  0x34   : > { %s997_s4 = scalar_lea.sflag [#allocation3], %s158_s17  ;;  %s762_s5 = scalar_lea.hbm %s989_s25, 512 }
  0x35   : > { %p763_p11 = scmp.ne.s32.totalorder %s989_s25, %s762_s5  ;;  %p764_p7 = pneg %p993_p2 }
  0x36   : > { %s767_s9 = scalar_lea.hbm %s1093_s0, 1024  ;;  %p768_p13 = scmp.lt.s32.totalorder %s989_s25, %s1093_s0 }
  0x37   : > { %p765_p9 = pnand %p764_p7, %p763_p11  ;;  %p769_p0 = scmp.lt.s32.totalorder %s767_s9, %s762_s5 }
  0x39   : > { %p766_p12 = pneg %p765_p9  ;;  %p770_p10 = por %p769_p0, %p768_p13 }
  0x3b   : > { %p771_p3 = pnand %p770_p10, %p766_p12 }
  0x3d   : > { %774 = shalt.err (!%p771_p3)
}
  0x3e   : > { %s775_s17 = scalar_lea.vmem %s991_s29, 512  ;;  %s864_s23 = smov [#allocation2]  }
  0x3f   : > { %p776_p1 = scmp.ne.s32.totalorder %s991_s29, %s775_s17  ;;  %s780_s24 = sshll.u32 %s864_s23, 4  ;;  %s781_s24 = int_to_ptr.vmem [resolvable:$false] %s780_s24 }
  0x40   : > { %s782_s26 = scalar_lea.vmem %s781_s24, 1024  ;;  %p783_p9 = scmp.lt.s32.totalorder %s991_s29, %s781_s24 }
  0x41   : > { %p778_p6 = pnand %p776_p1, %p764_p7  ;;  %p784_p5 = scmp.lt.s32.totalorder %s782_s26, %s775_s17 }
  0x43   : > { %p779_p11 = pneg %p778_p6  ;;  %p785_p4 = por %p784_p5, %p783_p9 }
  0x45   : > { %p786_p8 = pnand %p785_p4, %p779_p11 }
  0x47   : > { %789 = shalt.err (!%p786_p8)
}
  0x48   : > { %661 = dma.hbm_to_vmem [thread:$0]  (!%p993_p2), %s989_s25, 512, %s991_s29, %s997_s4, %s862_s27, %s862_s27, %s863_s28  }
  0x49   : > { %p1107_p1 = scmp.ne.s32.totalorder %s1103_s20, 0 }
  0x4a   : > { %s1024_s5 = sand.u32 (!%p1107_p1), 1, %s850_s13   ;;  %p1108_p4 = scmp.ne.s32.totalorder (!%p1107_p1), %s1101_s18, 0 }
  0x4b   : > { %181 = sbr.rel (%p1107_p1) target bundleno = 502 (0x1f6), region = 32  ;;  %s544_s6 = sshll.u32 (!%p1107_p1), %s1024_s5, 5 }
  0x4c   : > { %s184_s8 = scalar_lea.sflag (!%p1107_p1), [#allocation3], %s1024_s5  ;;  %s187_s30 = scalar_lea.vmem (!%p1107_p1), [#allocation2], %s544_s6 }
  0x50   : > { %833 = dma.done.wait (%p1108_p4), %s184_s8, 512  }
  0x51   : > { %835 = vsyncadd (%p1108_p4), %s184_s8, 4294966784  ;;  %p1109_p6 = scmp.eq.s32.totalorder %s909_s16, 0 }
  0x53   : > { %837 = dma.done.wait (%p1109_p6), [#allocation6], 2560   ;;  %p1110_p8 = pmov %p1109_p6 }
  0x54   : > { %vm226_vm0 = vcmask 261120   ;;  %v225_v0 = vld [vmem:[%s187_s30 + $0x18] sm:$0xff]  ;;  %v224_v1 = vld [vmem:[%s187_s30 + $0x10] sm:$0xff]  ;;  %v218_v2 = vld [vmem:[#allocation5] sm:$0xff]  ;;  %s217_s18 = scalar_lea.vmem [#allocation8], %s544_s6  ;;  %s558_s27 = sshll.u32 %s909_s16, 9 }
  0x55   : > { %839 = vsyncadd (%p1110_p8), [#allocation6], 4294964736  ;;  %587 = vmatprep.subr.mxu0 %v225_v0  ;;  %v223_v3 = vld [vmem:[%s187_s30 + $0x8] sm:$0xff]  ;;  %595 = vmatprep.mubr.msk.f32.mxu0 %vm226_vm0, %v218_v2  ;;  %v339_v4 = vld [vmem:[#allocation7 + $0x78] sm:$0xff]  ;;  %s443_s20 = sshll.u32 %s217_s18, 4  ;;  %s1050_s29 = scalar_lea.hbm %s1096_s3, %s558_s27  ;;  %s1045_s20 = int_to_ptr.vmem [resolvable:$true] %s443_s20 }
  0x56   : > { %588 = vmatpush3.msra.mxu0 %v225_v0  ;;  %601 = vmatprep.subr.mxu1 %v339_v4  ;;  %v338_v5 = vld [vmem:[#allocation7 + $0x70] sm:$0xff]  ;;  %v222_v6 = vld [vmem:[%s187_s30] sm:$0xff]  ;;  %v337_v7 = vld [vmem:[#allocation7 + $0x68] sm:$0xff]  ;;  %s430_s4 = scalar_lea.sflag [#allocation4], %s1024_s5  ;;  %s790_s9 = scalar_lea.vmem %s1045_s20, 512 }
  0x57   : > { %589 = vmatprep.subr.mxu0 %v224_v1  ;;  %602 = vmatpush3.msra.mxu1 %v339_v4  ;;  %v219_v8 = vld [vmem:[#allocation5 + $0x8] sm:$0xff]  ;;  %v336_v9 = vld [vmem:[#allocation7 + $0x60] sm:$0xff]  ;;  %v220_v10 = vld [vmem:[#allocation5 + $0x10] sm:$0xff]  ;;  %p791_p5 = scmp.ne.s32.totalorder %s1045_s20, %s790_s9  ;;  %p1111_p2 = scmp.ne.s32.totalorder %s1105_s10, 0 }
  0x58   : > { %590 = vmatpush3.msra.mxu0 %v224_v1  ;;  %603 = vmatprep.subr.mxu1 %v338_v5  ;;  %v335_v11 = vld [vmem:[#allocation7 + $0x58] sm:$0xff]  ;;  %v334_v13 = vld [vmem:[#allocation7 + $0x50] sm:$0xff]  ;;  %v333_v14 = vld [vmem:[#allocation7 + $0x48] sm:$0xff]  ;;  %s865_s16 = smov [#allocation8]  }
  0x59   : > { %591 = vmatprep.subr.mxu0 %v223_v3  ;;  %604 = vmatpush3.msra.mxu1 %v338_v5  ;;  %v221_v12 = vld [vmem:[#allocation5 + $0x18] sm:$0xff]  ;;  %v332_v15 = vld [vmem:[#allocation7 + $0x40] sm:$0xff]  ;;  %v330_v17 = vld [vmem:[#allocation7 + $0x30] sm:$0xff]  ;;  %p792_p7 = pnand %p791_p5, %p1111_p2  ;;  %s794_s21 = sshll.u32 %s865_s16, 4  ;;  %s795_s21 = int_to_ptr.vmem [resolvable:$false] %s794_s21 }
  0x5a   : > { %592 = vmatpush3.msra.mxu0 %v223_v3  ;;  %605 = vmatprep.subr.mxu1 %v337_v7  ;;  %v331_v16 = vld [vmem:[#allocation7 + $0x38] sm:$0xff]  ;;  %v329_v18 = vld [vmem:[#allocation7 + $0x28] sm:$0xff]  ;;  %v328_v19 = vld [vmem:[#allocation7 + $0x20] sm:$0xff]  ;;  %s796_s22 = scalar_lea.vmem %s795_s21, 1024  ;;  %p797_p13 = scmp.lt.s32.totalorder %s1045_s20, %s795_s21 }
  0x5b   : > { %593 = vmatprep.subr.mxu0 %v222_v6  ;;  %606 = vmatpush3.msra.mxu1 %v337_v7  ;;  %v327_v20 = vld [vmem:[#allocation7 + $0x18] sm:$0xff]  ;;  %v326_v21 = vld [vmem:[#allocation7 + $0x10] sm:$0xff]  ;;  %v325_v22 = vld [vmem:[#allocation7 + $0x8] sm:$0xff]  ;;  %p793_p12 = pneg %p792_p7  ;;  %p798_p0 = scmp.lt.s32.totalorder %s796_s22, %s790_s9 }
  0x5c   : > { %594 = vmatpush3.msra.mxu0 %v222_v6  ;;  %607 = vmatprep.subr.mxu1 %v336_v9  ;;  %v324_v23 = vld [vmem:[#allocation7] sm:$0xff] }
  0x5d   : > { %596 = vmatmul.mubr.msk.f32.vlgmr.msra.gmra.mxu0 %vm226_vm0, %v219_v8  ;;  %608 = vmatpush3.msra.mxu1 %v336_v9  ;;  %p799_p10 = por %p798_p0, %p797_p13 }
  0x5e   : > { %598 = vmatprep.mubr.msk.f32.mxu0 %vm226_vm0, %v220_v10  ;;  %609 = vmatprep.subr.mxu1 %v335_v11 }
  0x5f   : > { %610 = vmatpush3.msra.mxu1 %v335_v11  ;;  %p800_p3 = pnand %p799_p10, %p793_p12 }
  0x60   : > { %611 = vmatprep.subr.mxu1 %v334_v13 }
  0x61   : > { %599 = vmatmul.mubr.msk.f32.gmra.mxu0 %vm226_vm0, %v221_v12  ;;  %612 = vmatpush3.msra.mxu1 %v334_v13 }
  0x62   : > { %613 = vmatprep.subr.mxu1 %v333_v14 }
  0x63   : > { %614 = vmatpush3.msra.mxu1 %v333_v14 }
  0x64   : > { %615 = vmatprep.subr.mxu1 %v332_v15 }
  0x65   : > { %616 = vmatpush3.msra.mxu1 %v332_v15 }
  0x66   : > { %617 = vmatprep.subr.mxu1 %v331_v16 }
  0x67   : > { %618 = vmatpush3.msra.mxu1 %v331_v16 }
  0x68   : > { %619 = vmatprep.subr.mxu1 %v330_v17 }
  0x69   : > { %620 = vmatpush3.msra.mxu1 %v330_v17 }
  0x6a   : > { %621 = vmatprep.subr.mxu1 %v329_v18 }
  0x6b   : > { %622 = vmatpush3.msra.mxu1 %v329_v18 }
  0x6c   : > { %623 = vmatprep.subr.mxu1 %v328_v19 }
  0x6d   : > { %624 = vmatpush3.msra.mxu1 %v328_v19 }
  0x6e   : > { %625 = vmatprep.subr.mxu1 %v327_v20 }
  0x6f   : > { %626 = vmatpush3.msra.mxu1 %v327_v20 }
  0x70   : > { %627 = vmatprep.subr.mxu1 %v326_v21 }
  0x71   : > { %628 = vmatpush3.msra.mxu1 %v326_v21 }
  0x72   : > { %629 = vmatprep.subr.mxu1 %v325_v22 }
  0x73   : > { %630 = vmatpush3.msra.mxu1 %v325_v22 }
  0x74   : > { %631 = vmatprep.subr.mxu1 %v324_v23 }
  0x75   : > { %632 = vmatpush3.msra.mxu1 %v324_v23 }
 0x11d   : > { %v597_v24 = vpop.f32.mrf.mxu0 }
 0x11f   : > { %v305_v25 = vpop.f32.mrf.mxu0 }
 0x120   : > { %633 = vmatprep.mubr.f32.mxu1 %v305_v25 }
 0x121   : > { %v600_v26 = vpop.f32.mrf.mxu0  ;;  %634 = vmatmul.mubr.f32.vlgmr.msra.gmra.mxu1 %v597_v24 }
 0x123   : > { %v315_v27 = vpop.f32.mrf.mxu0 }
 0x124   : > { %636 = vmatprep.mubr.f32.mxu1 %v315_v27 }
 0x125   : > { %637 = vmatmul.mubr.f32.gmra.mxu1 %v600_v26 }
 0x1e1   : > { %v635_v28 = vpop.f32.mrf.mxu1 }
 0x1e2   : > { %426 = vst [vmem:[%s217_s18 + $0x8] sm:$0xff] %v635_v28 }
 0x1e3   : > { %v406_v29 = vpop.f32.mrf.mxu1 }
 0x1e4   : > { %425 = vst [vmem:[%s217_s18] sm:$0xff] %v406_v29 }
 0x1e5   : > { %v638_v30 = vpop.f32.mrf.mxu1 }
 0x1e6   : > { %428 = vst [vmem:[%s217_s18 + $0x18] sm:$0xff] %v638_v30 }
 0x1e7   : > { %v416_v31 = vpop.f32.mrf.mxu1 }
 0x1e8   : > { %427 = vst [vmem:[%s217_s18 + $0x10] sm:$0xff] %v416_v31 }
 0x1e9   : > { %803 = shalt.err (!%p800_p3)
}
 0x1ea   : > { %s804_s17 = scalar_lea.hbm %s1050_s29, 512  ;;  %s808_s26 = scalar_lea.hbm %s1096_s3, 1024 }
 0x1eb   : > { %p805_p11 = scmp.ne.s32.totalorder %s1050_s29, %s804_s17  ;;  %p809_p4 = scmp.lt.s32.totalorder %s1050_s29, %s1096_s3 }
 0x1ec   : > { %p810_p6 = scmp.lt.s32.totalorder %s808_s26, %s804_s17 }
 0x1ed   : > { %p806_p9 = pnand %p805_p11, %p1111_p2 }
 0x1ee   : > { %p811_p8 = por %p810_p6, %p809_p4 }
 0x1ef   : > { %p807_p1 = pneg %p806_p9 }
 0x1f1   : > { %p812_p5 = pnand %p811_p8, %p807_p1 }
 0x1f3   : > { %815 = shalt.err (!%p812_p5)
}
 0x1f4   : > { %s866_s30 = smov 128   ;;  %s867_s18 = smov 8  }
 0x1f5   : > { %649 = dma.vmem_to_hbm [thread:$0]  (%p1111_p2), %s1045_s20, 512, %s1050_s29, %s430_s4, %s866_s30, %s866_s30, %s867_s18  }
 0x1f6 PF: > { %s458_s27 = sand.u32 1, %s846_s12   ;;  %p1112_p7 = scmp.ne.s32.totalorder %s1102_s19, 0 }
 0x1f7   : > { %p1113_p12 = scmp.ge.s32.totalorder %s858_s15, 2  ;;  %s459_s28 = scalar_lea.sflag [#allocation4], %s458_s27 }
 0x1f9   : > { %p663_p13 = pnand %p1113_p12, %p1112_p7 }
 0x1fb   : > { %p664_p0 = pneg %p663_p13 }
 0x1fd   : > { %841 = dma.done.wait (%p664_p0), %s459_s28, 512  }
 0x1fe   : > { %843 = vsyncadd (%p664_p0), %s459_s28, 4294966784  ;;  %p17_p10 = scmp.ge.s32.totalorder %s966_s7, 4   ;;  %s1114_s12 = smov %s850_s13 }
 0x1ff   : > { %s1115_s13 = smov %s854_s14  ;;  %s1116_s14 = smov %s982_s11 }
 0x200   : > { %s1117_s15 = smov %s966_s7  ;;  %19 = sbr.rel (!%p17_p10) target bundleno = 6 (0x6), region = 85 }
 0x205   :  { %464 = vsyncpa [#allocation3], 1 }
 0x206   :  { %466 = vsyncpa [#allocation3 + $0x1], 1 }
 0x207   :  { %467 = vsyncpa [#allocation6], 1 }
 0x208   :  { %468 = vsyncpa [#allocation4], 1 }
 0x209   :  { %470 = vsyncpa [#allocation4 + $0x1], 1 }

</bundles_post_ra>
